<compile_context>
chip_gen: v6e
topology: v6e:2x2x1
jax: 0.10.0
libtpu: 0.0.40
codegen_flags: <defaults>
</compile_context>

<pallas_src>
import math

import jax
import jax.numpy as jnp
from jax.experimental import pallas as pl
from jax.experimental.pallas import tpu as pltpu

_LANES = 128
_STATS_TILE_BYTES = 4 << 20      # input-only pass: ~2x4 MiB buffers + small temps
_APPLY_TILE_BYTES = 4 << 20      # in+out double-buffered: ~2*(4+4) MiB + temps
_FUSED_MAX_SLAB_F32 = 4 << 20    # single-block fused path threshold (f32 slab bytes)
_VMEM_LIMIT_BYTES = 32 * 1024 * 1024


def _pack_geometry(C):
    """Packed lane width W = lcm(C, 128) (always a multiple of 128, no channel padding)
    and G = W // C original rows per packed row (always a power of two)."""
    g = math.gcd(C, _LANES)
    G = _LANES // g
    return C * G, G


def _num_tensorcores():
    """Best-effort TensorCore count (2 on v7x, 1 on v5e/v6e); defaults to 2."""
    try:
        info = pltpu.get_tpu_info()
        for name in ("num_cores", "core_count", "num_tensorcores",
                     "tensorcore_count", "num_cores_per_chip"):
            try:
                v = getattr(info, name, None)
                if v is not None:
                    v = int(v)
                    if v >= 1:
                        return v
            except Exception:
                continue
    except Exception:
        pass
    try:
        v = getattr(jax.devices()[0], "num_cores", None)
        if v:
            return int(v)
    except Exception:
        pass
    return 2


def _row_tile(mp, row_bytes, target_bytes, granule):
    """Largest row tile (multiple of `granule`) under target_bytes, clamped to mp."""
    rt = (target_bytes // row_bytes) // granule * granule
    rt = max(rt, granule)
    if rt >= mp:
        return mp, 1          # single full-extent block (no alignment constraint)
    return rt, -(-mp // rt)


# --------------------------------------------------------------------------------------
# Kernels
# --------------------------------------------------------------------------------------
def _make_stats_kernel(n_chunks, mp_valid, need_mask):
    """Per-lane sum / sum-of-squares over the row tiles of one shard.

    Accumulates into (1, W) f32 scratch in row chunks (bounds VMEM temporaries) and
    masks rows >= mp_valid (partial / duplicated boundary tiles) with an iota mask.
    """

    def kernel(x_ref, sum_ref, sumsq_ref, sum_sc, sumsq_sc):
        i = pl.program_id(1)

        @pl.when(i == 0)
        def _():
            sum_sc[...] = jnp.zeros_like(sum_sc)
            sumsq_sc[...] = jnp.zeros_like(sumsq_sc)

        rt, w = x_ref.shape
        chunk = rt // n_chunks
        tile_row0 = (pl.program_id(0) * pl.num_programs(1) + i) * rt

        for c in range(n_chunks):
            xk = x_ref[pl.ds(c * chunk, chunk), :].astype(jnp.float32)
            if need_mask:
                rows = tile_row0 + c * chunk + jax.lax.broadcasted_iota(
                    jnp.int32, (chunk, 1), 0)
                xk = jnp.where(rows < mp_valid, xk, 0.0)
            sum_sc[...] += jnp.sum(xk, axis=0, keepdims=True)
            sumsq_sc[...] += jnp.sum(xk * xk, axis=0, keepdims=True)

        @pl.when(i == pl.num_programs(1) - 1)
        def _():
            sum_ref[...] = jnp.broadcast_to(sum_sc[...], sum_ref.shape)
            sumsq_ref[...] = jnp.broadcast_to(sumsq_sc[...], sumsq_ref.shape)

    return kernel


def _apply_kernel(x_ref, scale_ref, bias_ref, o_ref):
    """y = x * scale + bias on a lane-dense row tile (OOB rows of the last partial
    tile compute garbage that Pallas drops on writeback)."""
    x = x_ref[...].astype(jnp.float32)
    o_ref[...] = (x * scale_ref[...] + bias_ref[...]).astype(o_ref.dtype)


def _make_fused_kernel(count, C, W, eps):
    """Single-pass stats + normalize for a VMEM-resident slab.

    The per-lane sums are folded across the G = W // C lane groups with a log2(G)
    roll-and-add butterfly (G is a power of two), so every lane ends up holding its
    channel's total and the scale/bias math stays fully in-kernel.
    """

    def kernel(x_ref, gamma_ref, beta_ref, o_ref):
        x = x_ref[...].astype(jnp.float32)                 # (mp, W)
        s = jnp.sum(x, axis=0, keepdims=True)              # (1, W)
        ss = jnp.sum(x * x, axis=0, keepdims=True)
        shift = C
        while shift < W:                                   # G is a power of two
            s = s + pltpu.roll(s, shift, axis=1)
            ss = ss + pltpu.roll(ss, shift, axis=1)
            shift *= 2
        inv_n = jnp.float32(1.0 / count)
        mean = s * inv_n
        var = jnp.maximum(ss * inv_n - mean * mean, 0.0)   # biased (training mode)
        inv = jax.lax.rsqrt(var + jnp.float32(eps))
        scale = gamma_ref[...] * inv
        bias = beta_ref[...] - mean * scale
        o_ref[...] = (x * scale + bias).astype(o_ref.dtype)

    return kernel


# --------------------------------------------------------------------------------------
# Wrapper
# --------------------------------------------------------------------------------------
def _batch_norm_2d(x2d, gamma, beta, *, eps=1e-5, use_fused=None,
                   stats_tile_bytes=_STATS_TILE_BYTES,
                   apply_tile_bytes=_APPLY_TILE_BYTES,
                   num_cores=None):
    """Training-mode batch norm over channels for x2d: [M, C] (channels-last)."""
    M, C = x2d.shape
    dtype = x2d.dtype
    itemsize = dtype.itemsize
    sub = 8 * max(1, 4 // itemsize)          # sublane granule: 8 (f32) / 16 (bf16)
    W, G = _pack_geometry(C)

    # ---- pack to a lane-dense [mp, W] slab --------------------------------------
    rem = M % G
    if rem:
        xp_src = jnp.pad(x2d, ((0, G - rem), (0, 0)))   # ragged path only (see TODO)
        Mp = M + (G - rem)
    else:
        xp_src = x2d                                    # fast path: zero copies
        Mp = M
    mp = Mp // G
    xp = xp_src.reshape(mp, W)                          # free (bitcast) reshape

    gamma32 = gamma.astype(jnp.float32).reshape(C)
    beta32 = beta.astype(jnp.float32).reshape(C)

    slab_f32 = mp * W * 4
    if use_fused is None:
        use_fused = slab_f32 <= _FUSED_MAX_SLAB_F32

    if use_fused:
        # ---- fused single pass: x read once, y written once --------------------
        gamma_w = jnp.tile(gamma32, G).reshape(1, W)
        beta_w = jnp.tile(beta32, G).reshape(1, W)
        yp = pl.pallas_call(
            _make_fused_kernel(float(M), C, W, eps),
            out_shape=jax.ShapeDtypeStruct((mp, W), dtype),
            grid=(1,),
            in_specs=[pl.BlockSpec((mp, W), lambda i: (0, 0)),
                      pl.BlockSpec((1, W), lambda i: (0, 0)),
                      pl.BlockSpec((1, W), lambda i: (0, 0))],
            out_specs=pl.BlockSpec((mp, W), lambda i: (0, 0)),
            compiler_params=pltpu.CompilerParams(
                vmem_limit_bytes=_VMEM_LIMIT_BYTES),
        )(xp, gamma_w, beta_w)
    else:
        # ---- pass 1: per-lane sum / sumsq ---------------------------------------
        granule = 4 * sub
        rt, ntiles = _row_tile(mp, W * itemsize, stats_tile_bytes, granule)
        ncores = num_cores if num_cores is not None else _num_tensorcores()
        nshards = ncores if (ncores > 1 and ntiles >= 2 * ncores) else 1
        tps = -(-ntiles // nshards)
        need_mask = (nshards * tps * rt != mp)
        n_chunks = 4 if (rt % (4 * sub) == 0 and rt >= 4 * sub) else 1

        def _stats_in_map(s, i, tps=tps, nt=ntiles):
            # Clamp so shard-padding tiles re-read an in-bounds block (masked anyway).
            return (jnp.minimum(s * tps + i, nt - 1), 0)

        sums, sumsqs = pl.pallas_call(
            _make_stats_kernel(n_chunks, mp, need_mask),
            out_shape=(jax.ShapeDtypeStruct((nshards * 8, W), jnp.float32),
                       jax.ShapeDtypeStruct((nshards * 8, W), jnp.float32)),
            grid=(nshards, tps),
            in_specs=[pl.BlockSpec((rt, W), _stats_in_map)],
            out_specs=(pl.BlockSpec((8, W), lambda s, i: (s, 0)),
                       pl.BlockSpec((8, W), lambda s, i: (s, 0))),
            scratch_shapes=[pltpu.VMEM((1, W), jnp.float32),
                            pltpu.VMEM((1, W), jnp.float32)],
            compiler_params=pltpu.CompilerParams(
                dimension_semantics=("parallel", "arbitrary"),
                vmem_limit_bytes=_VMEM_LIMIT_BYTES),
        )(xp)

        # ---- fold shard / group partials and precompute scale, bias (tiny) ------
        sum_w = sums.reshape(nshards, 8, W)[:, 0, :].sum(axis=0)
        sumsq_w = sumsqs.reshape(nshards, 8, W)[:, 0, :].sum(axis=0)
        if G > 1:
            sum_c = sum_w.reshape(G, C).sum(axis=0)
            sumsq_c = sumsq_w.reshape(G, C).sum(axis=0)
        else:
            sum_c, sumsq_c = sum_w, sumsq_w

        count = jnp.float32(M)
        mean = sum_c / count
        var = jnp.maximum(sumsq_c / count - mean * mean, 0.0)   # biased variance
        inv = jax.lax.rsqrt(var + jnp.float32(eps))
        scale_c = gamma32 * inv
        bias_c = beta32 - mean * scale_c
        scale_w = jnp.tile(scale_c, G).reshape(1, W)
        bias_w = jnp.tile(bias_c, G).reshape(1, W)

        # ---- pass 2: normalize + affine ------------------------------------------
        rta, napply = _row_tile(mp, W * itemsize, apply_tile_bytes, sub)
        yp = pl.pallas_call(
            _apply_kernel,
            out_shape=jax.ShapeDtypeStruct((mp, W), dtype),
            grid=(napply,),
            in_specs=[pl.BlockSpec((rta, W), lambda i: (i, 0)),
                      pl.BlockSpec((1, W), lambda i: (0, 0)),
                      pl.BlockSpec((1, W), lambda i: (0, 0))],
            out_specs=pl.BlockSpec((rta, W), lambda i: (i, 0)),
            compiler_params=pltpu.CompilerParams(
                dimension_semantics=("parallel",),
                vmem_limit_bytes=_VMEM_LIMIT_BYTES),
        )(xp, scale_w, bias_w)

    # ---- unpack back to [M, C] (free reshape; slice only on the ragged path) ----
    y = yp.reshape(Mp, C)
    if rem:
        y = y[:M]
    return y


def point_batch_norm(x, gamma, beta, *, eps=1e-5, **kwargs):
    """JAX/Pallas equivalent of PointBatchNorm.forward (training-mode BatchNorm1d).

    x: [M, C] or [M, L, C] with channels last.
    """
    if x.ndim == 3:
        M, L, C = x.shape
        y = _batch_norm_2d(x.reshape(M * L, C), gamma, beta, eps=eps, **kwargs)
        return y.reshape(M, L, C)
    if x.ndim == 2:
        return _batch_norm_2d(x, gamma, beta, eps=eps, **kwargs)
    raise NotImplementedError


def _reference(x, gamma, beta, eps=1e-5):
    """Pure-JAX reference (training-mode batch norm over the channel axis)."""
    if x.ndim == 3:
        M, L, C = x.shape
        flat = x.reshape(M * L, C).astype(jnp.float32)
    else:
        flat = x.astype(jnp.float32)
    mean = flat.mean(axis=0, keepdims=True)
    var = flat.var(axis=0, keepdims=True)  # biased
    y = (flat - mean) * jax.lax.rsqrt(var + eps) * gamma.reshape(1, -1) + beta.reshape(1, -1)
    return y.reshape(x.shape).astype(x.dtype)


if __name__ == "__main__":
    key = jax.random.PRNGKey(0)
    k1, k2, k3 = jax.random.split(key, 3)

    embed_channels = 8
    gamma = 1.0 + 0.1 * jnp.arange(embed_channels, dtype=jnp.float32)
    beta = 0.05 * jnp.arange(embed_channels, dtype=jnp.float32)

    # 2-D ragged (M % G != 0) -> padded + fused single-pass path.
    x2 = jax.random.normal(k1, (37, embed_channels), dtype=jnp.float32)
    y2 = point_batch_norm(x2, gamma, beta)

    # 3-D ragged -> fused single-pass path.
    x3 = jax.random.normal(k2, (10, 7, embed_channels), dtype=jnp.float32)
    y3 = point_batch_norm(x3, gamma, beta)

    # 2-D aligned (M % G == 0: zero-copy pack/unpack). Run it twice:
    #   * forced two-pass with tiny tiles to exercise stats sharding, the masked
    #     partial stats tile and the partial apply tile;
    #   * default dispatch (fused, slab fits VMEM).
    x4 = jax.random.normal(k3, (4000, embed_channels), dtype=jnp.float32)
    y4_two_pass = point_batch_norm(
        x4, gamma, beta,
        use_fused=False,
        stats_tile_bytes=16 * 128 * 4,
        apply_tile_bytes=48 * 128 * 4,
        num_cores=2,
    )
    y4_fused = point_batch_norm(x4, gamma, beta)

    jax.block_until_ready((y2, y3, y4_two_pass, y4_fused))

    assert y2.shape == x2.shape and y3.shape == x3.shape and y4_fused.shape == x4.shape
    assert jnp.allclose(y2, _reference(x2, gamma, beta), atol=1e-4, rtol=1e-4)
    assert jnp.allclose(y3, _reference(x3, gamma, beta), atol=1e-4, rtol=1e-4)
    ref4 = _reference(x4, gamma, beta)
    assert jnp.allclose(y4_two_pass, ref4, atol=1e-4, rtol=1e-4)
    assert jnp.allclose(y4_fused, ref4, atol=1e-4, rtol=1e-4)

    print("KERNEL_OK")
</pallas_src>

<mosaic_0001>
module attributes {stable_mosaic.version = 11 : i64} {
  func.func @kernel(%arg0: i32, %arg1: memref<3x128xf32, #tpu.memory_space<vmem>>, %arg2: memref<1x128xf32, #tpu.memory_space<vmem>>, %arg3: memref<1x128xf32, #tpu.memory_space<vmem>>, %arg4: memref<3x128xf32, #tpu.memory_space<vmem>>) attributes {dimension_semantics = [#tpu.dimension_semantics<arbitrary>], iteration_bounds = array<i64: 1>, scalar_prefetch = 0 : i64, scratch_operands = 0 : i64, tpu.core_type = #tpu.core_type<tc>, window_params = [{pipeline_mode = #tpu.pipeline_mode<synchronous>, transform_indices = @transform_0, window_bounds = array<i64: 3, 128>}, {pipeline_mode = #tpu.pipeline_mode<synchronous>, transform_indices = @transform_1, window_bounds = array<i64: 1, 128>}, {pipeline_mode = #tpu.pipeline_mode<synchronous>, transform_indices = @transform_2, window_bounds = array<i64: 1, 128>}, {pipeline_mode = #tpu.pipeline_mode<synchronous>, transform_indices = @transform_3, window_bounds = array<i64: 3, 128>}]} {
    %c0 = arith.constant 0 : index
    %c0_0 = arith.constant 0 : index
    %0 = vector.load %arg1[%c0, %c0_0] : memref<3x128xf32, #tpu.memory_space<vmem>>, vector<3x128xf32>
    %cst = arith.constant dense<0.000000e+00> : vector<128xf32>
    %1 = vector.multi_reduction <add>, %0, %cst [0] : vector<3x128xf32> to vector<128xf32>
    %2 = vector.shape_cast %1 : vector<128xf32> to vector<1x128xf32>
    %3 = arith.mulf %0, %0 : vector<3x128xf32>
    %cst_1 = arith.constant dense<0.000000e+00> : vector<128xf32>
    %4 = vector.multi_reduction <add>, %3, %cst_1 [0] : vector<3x128xf32> to vector<128xf32>
    %5 = vector.shape_cast %4 : vector<128xf32> to vector<1x128xf32>
    %c8_i32 = arith.constant 8 : i32
    %6 = tpu.dynamic_rotate %2 by %c8_i32 dim 1 : vector<1x128xf32>, i32 -> vector<1x128xf32>
    %7 = arith.addf %2, %6 : vector<1x128xf32>
    %c8_i32_2 = arith.constant 8 : i32
    %8 = tpu.dynamic_rotate %5 by %c8_i32_2 dim 1 : vector<1x128xf32>, i32 -> vector<1x128xf32>
    %9 = arith.addf %5, %8 : vector<1x128xf32>
    %c16_i32 = arith.constant 16 : i32
    %10 = tpu.dynamic_rotate %7 by %c16_i32 dim 1 : vector<1x128xf32>, i32 -> vector<1x128xf32>
    %11 = arith.addf %7, %10 : vector<1x128xf32>
    %c16_i32_3 = arith.constant 16 : i32
    %12 = tpu.dynamic_rotate %9 by %c16_i32_3 dim 1 : vector<1x128xf32>, i32 -> vector<1x128xf32>
    %13 = arith.addf %9, %12 : vector<1x128xf32>
    %c32_i32 = arith.constant 32 : i32
    %14 = tpu.dynamic_rotate %11 by %c32_i32 dim 1 : vector<1x128xf32>, i32 -> vector<1x128xf32>
    %15 = arith.addf %11, %14 : vector<1x128xf32>
    %c32_i32_4 = arith.constant 32 : i32
    %16 = tpu.dynamic_rotate %13 by %c32_i32_4 dim 1 : vector<1x128xf32>, i32 -> vector<1x128xf32>
    %17 = arith.addf %13, %16 : vector<1x128xf32>
    %c64_i32 = arith.constant 64 : i32
    %18 = tpu.dynamic_rotate %15 by %c64_i32 dim 1 : vector<1x128xf32>, i32 -> vector<1x128xf32>
    %19 = arith.addf %15, %18 : vector<1x128xf32>
    %c64_i32_5 = arith.constant 64 : i32
    %20 = tpu.dynamic_rotate %17 by %c64_i32_5 dim 1 : vector<1x128xf32>, i32 -> vector<1x128xf32>
    %21 = arith.addf %17, %20 : vector<1x128xf32>
    %cst_6 = arith.constant 0.0270270277 : f32
    %22 = vector.broadcast %cst_6 : f32 to vector<1x128xf32>
    %23 = arith.mulf %19, %22 : vector<1x128xf32>
    %cst_7 = arith.constant 0.0270270277 : f32
    %24 = vector.broadcast %cst_7 : f32 to vector<1x128xf32>
    %25 = arith.mulf %21, %24 : vector<1x128xf32>
    %26 = arith.mulf %23, %23 : vector<1x128xf32>
    %27 = arith.subf %25, %26 : vector<1x128xf32>
    %cst_8 = arith.constant 0.000000e+00 : f32
    %28 = vector.broadcast %cst_8 : f32 to vector<1x128xf32>
    %29 = arith.maximumf %27, %28 : vector<1x128xf32>
    %cst_9 = arith.constant 9.99999974E-6 : f32
    %30 = vector.broadcast %cst_9 : f32 to vector<1x128xf32>
    %31 = arith.addf %29, %30 : vector<1x128xf32>
    %32 = math.rsqrt %31 : vector<1x128xf32>
    %c0_10 = arith.constant 0 : index
    %c0_11 = arith.constant 0 : index
    %33 = vector.load %arg2[%c0_10, %c0_11] : memref<1x128xf32, #tpu.memory_space<vmem>>, vector<1x128xf32>
    %34 = arith.mulf %33, %32 : vector<1x128xf32>
    %c0_12 = arith.constant 0 : index
    %c0_13 = arith.constant 0 : index
    %35 = vector.load %arg3[%c0_12, %c0_13] : memref<1x128xf32, #tpu.memory_space<vmem>>, vector<1x128xf32>
    %36 = arith.mulf %23, %34 : vector<1x128xf32>
    %37 = arith.subf %35, %36 : vector<1x128xf32>
    %38 = vector.broadcast %34 : vector<1x128xf32> to vector<3x128xf32>
    %39 = arith.mulf %0, %38 : vector<3x128xf32>
    %40 = vector.broadcast %37 : vector<1x128xf32> to vector<3x128xf32>
    %41 = arith.addf %39, %40 : vector<3x128xf32>
    %c0_14 = arith.constant 0 : index
    %c0_15 = arith.constant 0 : index
    %42 = vector.load %arg4[%c0_14, %c0_15] : memref<3x128xf32, #tpu.memory_space<vmem>>, vector<3x128xf32>
    tpu.vector_store %arg4[%c0_14, %c0_15], %41 {strides = array<i32>} : memref<3x128xf32, #tpu.memory_space<vmem>>, vector<3x128xf32>,
    return
  }
  func.func @transform_0(%arg0: i32) -> (i32, i32) {
    %c0_i32 = arith.constant 0 : i32
    %c0_i32_0 = arith.constant 0 : i32
    %c0_i32_1 = arith.constant 0 : i32
    return %c0_i32, %c0_i32_0 : i32, i32
  }
  func.func @transform_1(%arg0: i32) -> (i32, i32) {
    %c0_i32 = arith.constant 0 : i32
    %c0_i32_0 = arith.constant 0 : i32
    %c0_i32_1 = arith.constant 0 : i32
    return %c0_i32, %c0_i32_0 : i32, i32
  }
  func.func @transform_2(%arg0: i32) -> (i32, i32) {
    %c0_i32 = arith.constant 0 : i32
    %c0_i32_0 = arith.constant 0 : i32
    %c0_i32_1 = arith.constant 0 : i32
    return %c0_i32, %c0_i32_0 : i32, i32
  }
  func.func @transform_3(%arg0: i32) -> (i32, i32) {
    %c0_i32 = arith.constant 0 : i32
    %c0_i32_0 = arith.constant 0 : i32
    %c0_i32_1 = arith.constant 0 : i32
    return %c0_i32, %c0_i32_0 : i32, i32
  }
}

</mosaic_0001>

<bundles_post_ra>
// kernel: tpu_custom_call.1
= control target key start
LH: loop header
LB: loop body
LE: loop exit
PB: predicated region body
PF: predicated region fallthrough
CT: control target
= control target key end

     0   :  { %8 = vsyncpa [#allocation3], 0  ;;  %s206_s0 = inlined_call_operand.hbm [shape: f32[3,128], index: 0, kind: input, shape index: {}]   ;;  %s207_s1 = inlined_call_operand.vmem [shape: f32[1,128], index: 1, kind: input, shape index: {}]   ;;  %s208_s2 = inlined_call_operand.vmem [shape: f32[1,128], index: 2, kind: input, shape index: {}]   ;;  %s209_s3 = inlined_call_operand.hbm [shape: f32[3,128], index: 3, kind: output, shape index: {}]  }
   0x1   :  { %9 = vsyncpa [#allocation4], 0  ;;  %s162_s12 = smov [#allocation2]  }
   0x2   :  { %s16_s13 = sshll.u32 %s162_s12, 4  ;;  %s17_s13 = int_to_ptr.vmem [resolvable:$true] %s16_s13 }
   0x3   :  { %s126_s14 = scalar_lea.vmem %s17_s13, 64  ;;  %p131_p1 = scmp.lt.s32.totalorder %s17_s13, %s17_s13 }
   0x4   :  { %p127_p0 = scmp.ne.s32.totalorder %s17_s13, %s126_s14  ;;  %p132_p2 = scmp.lt.s32.totalorder %s126_s14, %s126_s14 }
   0x6   :  { %p133_p3 = por %p132_p2, %p131_p1 }
   0x8   :  { %p134_p4 = pnand %p133_p3, %p127_p0 }
   0xa   :  { %137 = shalt.err (!%p134_p4)
}
   0xb   :  { %19 = dma.hbm_to_vmem [thread:$0]  %s206_s0, 64, %s17_s13, [#allocation3]  }
   0xc   :  { %158 = dma.done.wait [#allocation3], 64  }
   0xd   :  { %159 = vsyncadd [#allocation3], 4294967232  ;;  %vm28_vm0 = vcmask 1042432   ;;  %v191_v0 = vld [vmem:[#allocation2] sm:$0x7]  ;;  %s163_s0 = smov 8   ;;  %v81_v38 = vlaneseq }
   0xe   :  { %v29_v1 = vsel %vm28_vm0, %v191_v0, 0.0  ;;  %v36_v2 = vmul.f32 %v191_v0, %v191_v0  ;;  %s164_s17 = smov 16   ;;  %s165_s18 = smov 32   ;;  %v75_v40 = vld [vmem:[%s207_s1] sm:$0x1] }
   0xf   :  { %v30_v3 = vrot.slane %v29_v1, 4  ;;  %s166_s19 = smov 64   ;;  %v82_v39 = vshrl.u32 %v81_v38, 7  ;;  %v77_v44 = vld [vmem:[%s208_s2] sm:$0x1]  ;;  %s167_s24 = smov [#allocation5]  }
  0x10   :  { %v37_v4 = vsel %vm28_vm0, %v36_v2, 0.0  ;;  %s101_s25 = sshll.u32 %s167_s24, 4  ;;  %s102_s25 = int_to_ptr.vmem [resolvable:$true] %s101_s25 }
  0x11   :  { %v31_v5 = vadd.f32 %v30_v3, %v29_v1  ;;  %v38_v6 = vrot.slane %v37_v4, 4  ;;  %v83_v41 = vsub.s32 0, %v82_v39  ;;  %s138_s26 = scalar_lea.vmem %s102_s25, 64  ;;  %p143_p6 = scmp.lt.s32.totalorder %s102_s25, %s102_s25 }
  0x12   :  { %p139_p5 = scmp.ne.s32.totalorder %s102_s25, %s138_s26  ;;  %p144_p7 = scmp.lt.s32.totalorder %s138_s26, %s138_s26 }
  0x13   :  { %v32_v7 = vrot.slane %v31_v5, 2  ;;  %v39_v8 = vadd.f32 %v38_v6, %v37_v4 }
  0x14   :  { %p145_p8 = por %p144_p7, %p143_p6 }
  0x15   :  { %v33_v9 = vadd.f32 %v32_v7, %v31_v5  ;;  %v40_v10 = vrot.slane %v39_v8, 2 }
  0x16   :  { %p146_p9 = pnand %p145_p8, %p139_p5 }
  0x17   :  { %v34_v11 = vrot.slane %v33_v9, 1  ;;  %v41_v12 = vadd.f32 %v40_v10, %v39_v8 }
  0x19   :  { %v35_v13 = vadd.f32 %v34_v11, %v33_v9  ;;  %v42_v14 = vrot.slane %v41_v12, 1 }
  0x1b   :  { %44 = vrot.lane.b32.xlu0 %v35_v13, %s163_s0  ;;  %v43_v15 = vadd.f32 %v42_v14, %v41_v12 }
  0x1f   :  { %47 = vrot.lane.b32.xlu0 %v43_v15, %s163_s0 }
  0x8d   :  { %v45_v16 = vpop.permute.xlu0 %44 }
  0x8e   :  { %v46_v17 = vadd.f32 %v45_v16, %v35_v13 }
  0x90   :  { %50 = vrot.lane.b32.xlu1 %v46_v17, %s164_s17 }
  0x91   :  { %v48_v18 = vpop.permute.xlu0 %47 }
  0x92   :  { %v49_v19 = vadd.f32 %v48_v18, %v43_v15 }
  0x94   :  { %53 = vrot.lane.b32.xlu1 %v49_v19, %s164_s17 }
 0x102   :  { %v51_v20 = vpop.permute.xlu1 %50 }
 0x103   :  { %v52_v21 = vadd.f32 %v51_v20, %v46_v17 }
 0x105   :  { %56 = vrot.lane.b32.xlu0 %v52_v21, %s165_s18 }
 0x106   :  { %v54_v22 = vpop.permute.xlu1 %53 }
 0x107   :  { %v55_v23 = vadd.f32 %v54_v22, %v49_v19 }
 0x109   :  { %59 = vrot.lane.b32.xlu1 %v55_v23, %s165_s18 }
 0x177   :  { %v57_v24 = vpop.permute.xlu0 %56 }
 0x178   :  { %v58_v25 = vadd.f32 %v57_v24, %v52_v21 }
 0x17a   :  { %62 = vrot.lane.b32.xlu0 %v58_v25, %s166_s19 }
 0x17b   :  { %v60_v26 = vpop.permute.xlu1 %59 }
 0x17c   :  { %v61_v27 = vadd.f32 %v60_v26, %v55_v23 }
 0x17e   :  { %65 = vrot.lane.b32.xlu1 %v61_v27, %s166_s19 }
 0x1ec   :  { %v63_v28 = vpop.permute.xlu0 %62 }
 0x1ed   :  { %v64_v29 = vadd.f32 %v63_v28, %v58_v25 }
 0x1ef   :  { %v68_v30 = vmul.f32 0.027027028, %v64_v29 }
 0x1f0   :  { %v66_v31 = vpop.permute.xlu1 %65 }
 0x1f1   :  { %v67_v32 = vadd.f32 %v66_v31, %v61_v27  ;;  %v70_v33 = vmul.f32 %v68_v30, %v68_v30 }
 0x1f3   :  { %v69_v34 = vmul.f32 0.027027028, %v67_v32 }
 0x1f5   :  { %v71_v35 = vsub.f32 %v69_v34, %v70_v33 }
 0x1f7   :  { %v72_v36 = vmax.f32 %v71_v35, 0.0 }
 0x1f9   :  { %v73_v37 = vadd.f32 1e-05, %v72_v36 }
 0x1fb   :  { %116 = vrsqrt.f32 %v73_v37 }
 0x208   :  { %v117_v42 = vpop.eup %116 }
 0x209   :  { %v76_v43 = vmul.f32 %v117_v42, %v75_v40 }
 0x20b   :  { %v78_v45 = vmul.f32 %v76_v43, %v68_v30  ;;  %v84_v46 = vrot.slane %v76_v43, %v83_v41 }
 0x20d   :  { %v79_v47 = vsub.f32 %v77_v44, %v78_v45  ;;  %v86_v48 = vmul.f32 %v84_v46, %v191_v0 }
 0x20f   :  { %v91_v49 = vrot.slane %v79_v47, %v83_v41 }
 0x211   :  { %v93_v50 = vadd.f32 %v91_v49, %v86_v48 }
 0x213   :  { %94 = vst [vmem:[#allocation5] sm:$0x7] %v93_v50 }
 0x214   :  { %149 = shalt.err (!%p146_p9)
}
 0x215   :  { %104 = dma.vmem_to_hbm [thread:$0]  %s102_s25, 64, %s209_s3, [#allocation4]  }
 0x216   :  { %160 = dma.done.wait [#allocation4], 64  }
 0x217   :  { %161 = vsyncadd [#allocation4], 4294967232 }
 0x218   :  { %108 = vsyncpa [#allocation3], 1 }
 0x219   :  { %109 = vsyncpa [#allocation4], 1 }

</bundles_post_ra>
